<compile_context>
chip_gen: v5e
topology: v5e:2x2
jax: 0.10.0
libtpu: 0.0.40
codegen_flags: <defaults>
</compile_context>

<pallas_src>
import jax
import jax.numpy as jnp
from jax.experimental import pallas as pl
from jax.experimental.pallas import tpu as pltpu

BN_EPS = 1e-5
KERNEL_SIZES = (3, 5)
HIDDEN_SIZES = (128, 96, 64, 32, 1)   # scaled-down analogue of [1024, 768, 512, 256, 1]
PAD = 128                             # lane-dense padding for the MLP / output


def _round_up(n, m):
    return ((n + m - 1) // m) * m


def _mish_cheap(v):
    # Mish = x * tanh(softplus(x)).  With t = exp(x):
    #   tanh(softplus(x)) = (t^2 + 2t) / (t^2 + 2t + 2)
    # 1 exp + 1 approx reciprocal on the EUP; adds/muls go to the 4-slot VPU.
    t = jnp.exp(jnp.minimum(v, 20.0))
    u = t * t + 2.0 * t
    m = v * u * pl.reciprocal(u + 2.0, approx=True)
    return jnp.where(v > 20.0, v, m)


def _mish_exact(v):
    return v * jnp.tanh(jax.nn.softplus(v))


def affinity_kernel(x_ref, incw1_ref, incb1_ref, incw2_ref, incb2_ref,
                    w0_ref, b0_ref, wr_ref, br_ref, out_ref):
    """Inception x2 + MLP regressor on one [TB, D] tile of pooled features."""
    x_bf = x_ref[...]                      # [TB, D] bf16 (pooled features)
    x = x_bf.astype(jnp.float32)           # f32 copy for the residual path

    # --- two ResidualInceptionBlocks, both branches fused per matmul --------
    # Weight refs are indexed at point of use (one [D,2D] / [2D,D] slab live
    # at a time) to keep vreg pressure low.
    for blk in range(2):
        lhs = x_bf if blk == 0 else x.astype(jnp.bfloat16)
        # both Conv1x1 + BN + ReLU in one [D, 2D] matmul
        y = jnp.dot(lhs, incw1_ref[blk],
                    preferred_element_type=jnp.float32) + incb1_ref[blk]
        y = jnp.maximum(y, 0.0)                              # [TB, 2D]
        # both Conv_k + BN + ReLU via block-diagonal [2D, D]; output IS the concat
        z = jnp.dot(y.astype(jnp.bfloat16), incw2_ref[blk],
                    preferred_element_type=jnp.float32) + incb2_ref[blk]
        z = jnp.maximum(z, 0.0)                              # [TB, D] (Dropout p=0)
        x = jnp.maximum(z + x, 0.0)                          # identity residual + ReLU

    # --- regressor MLP: Linear + Mish x4, final Linear (zero-padded to 128) --
    h = jnp.dot(x.astype(jnp.bfloat16), w0_ref[...],
                preferred_element_type=jnp.float32) + b0_ref[...]
    h = _mish_cheap(h)
    for i in range(3):
        h = jnp.dot(h.astype(jnp.bfloat16), wr_ref[i],
                    preferred_element_type=jnp.float32) + br_ref[i]
        h = _mish_cheap(h)
    out_ref[...] = jnp.dot(h.astype(jnp.bfloat16), wr_ref[3],
                           preferred_element_type=jnp.float32) + br_ref[3]


def init_params(key, Dp, Dm, hidden_sizes=HIDDEN_SIZES, kernel_sizes=KERNEL_SIZES):
    """Synthetic PyTorch-style params -> (packed kernel params, raw reference params)."""
    assert len(kernel_sizes) == 2
    D = Dp + Dm
    Dh = D // 2
    P = PAD
    assert max(hidden_sizes) <= P
    s = 1.0 / float(jnp.sqrt(1.0 + BN_EPS))                  # folded eval-mode BatchNorm

    keys = iter(jax.random.split(key, 64))

    def uinit(k, fan_in, shape):
        bound = 1.0 / (fan_in ** 0.5)
        return jax.random.uniform(k, shape, jnp.float32, -bound, bound)

    raw_inc = []
    incw1, incb1, incw2, incb2 = [], [], [], []
    for _blk in range(2):
        branches = []
        for kern in kernel_sizes:
            W1 = uinit(next(keys), D, (D, D))                 # Conv1d(D, D, 1) [out, in]
            b1 = uinit(next(keys), D, (D,))
            W2full = uinit(next(keys), D * kern, (Dh, D, kern))  # Conv1d(D, Dh, k)
            b2 = uinit(next(keys), D * kern, (Dh,))
            W2 = W2full[:, :, kern // 2]                      # center tap (L == 1 input)
            branches.append(((W1 * s).T, b1 * s, (W2 * s).T, b2 * s))   # [in, out] layout
        raw_inc.append(branches)
        # fuse both 1x1 convs into a single [D, 2D] matmul
        incw1.append(jnp.concatenate([branches[0][0], branches[1][0]], axis=1))
        incb1.append(jnp.concatenate([branches[0][1], branches[1][1]])[None, :])
        # fuse both k-convs as a block-diagonal [2D, D]: output is the branch concat
        # (kept block-diagonal while Dh < 128; split into two dense matmuls at scale)
        w2bd = jnp.zeros((2 * D, D), jnp.float32)
        w2bd = w2bd.at[:D, :Dh].set(branches[0][2])
        w2bd = w2bd.at[D:, Dh:].set(branches[1][2])
        incw2.append(w2bd)
        incb2.append(jnp.concatenate([branches[0][3], branches[1][3]])[None, :])
    incw1 = jnp.stack(incw1).astype(jnp.bfloat16)             # [2, D, 2D]
    incb1 = jnp.stack(incb1)                                   # [2, 1, 2D]
    incw2 = jnp.stack(incw2).astype(jnp.bfloat16)              # [2, 2D, D]
    incb2 = jnp.stack(incb2)                                   # [2, 1, D]

    raw_mlp = []
    in_dim = D
    for out_dim in hidden_sizes:
        W = uinit(next(keys), in_dim, (out_dim, in_dim))       # nn.Linear [out, in]
        b = uinit(next(keys), in_dim, (out_dim,))
        raw_mlp.append((W.T, b))                               # [in, out]
        in_dim = out_dim

    # pack the MLP: first layer [D, P]; remaining 4 layers stacked [4, P, P]
    h0 = hidden_sizes[0]
    w0 = jnp.zeros((D, P), jnp.float32).at[:, :h0].set(raw_mlp[0][0])
    b0 = jnp.zeros((1, P), jnp.float32).at[0, :h0].set(raw_mlp[0][1])
    wr, br = [], []
    prev = h0
    for (Wt, b), out_dim in zip(raw_mlp[1:], hidden_sizes[1:]):
        wr.append(jnp.zeros((P, P), jnp.float32).at[:prev, :out_dim].set(Wt))
        br.append(jnp.zeros((1, P), jnp.float32).at[0, :out_dim].set(b))
        prev = out_dim
    wr = jnp.stack(wr).astype(jnp.bfloat16)                    # [4, P, P]
    br = jnp.stack(br)                                         # [4, 1, P]

    packed = (incw1, incb1, incw2, incb2, w0.astype(jnp.bfloat16), b0, wr, br)
    raw = (raw_inc, raw_mlp)
    return packed, raw


@jax.jit
def affinity_predictor(prot_h, mol_h, packed):
    incw1, incb1, incw2, incb2, w0, b0, wr, br = packed
    B = prot_h.shape[0]
    P = PAD

    # sequence mean-pool + concat outside the kernel: kernel DMA is [B, D] bf16,
    # not [B, L, D] f32 (L x less batch-proportional HBM->VMEM traffic).
    x = jnp.concatenate([jnp.mean(prot_h, axis=1), jnp.mean(mol_h, axis=1)],
                        axis=-1).astype(jnp.bfloat16)
    D = x.shape[-1]

    # Batch tiling: sublane-aligned tiles up to 512 rows (amortize per-step
    # overhead, fill MXU M dim); guarantee grid >= 2 when B > 8 so the
    # "parallel" axis shards across both v7x TensorCores (free on v5e/v6e).
    B8 = _round_up(B, 8)
    if B8 <= 8:
        TB = B8
    else:
        TB = min(512, _round_up(pl.cdiv(B8, 2), 8))
    B_pad = _round_up(B8, TB)
    if B_pad != B:
        x = jnp.pad(x, ((0, B_pad - B), (0, 0)))
    grid = (B_pad // TB,)

    rep3 = lambda i: (0, 0, 0)
    rep2 = lambda i: (0, 0)

    flops = B_pad * (2 * (2 * D * 2 * D + 2 * 2 * D * D) + 2 * D * P + 8 * P * P)
    weight_bytes = sum(int(a.size) * a.dtype.itemsize
                       for a in (incw1, incb1, incw2, incb2, w0, b0, wr, br))
    act_bytes = TB * D * x.dtype.itemsize + TB * P * 4
    bytes_acc = int(B_pad * D * x.dtype.itemsize) + weight_bytes + B_pad * P * 4
    # double-buffered weights + activations, with headroom; sized per problem.
    vmem_limit = int(min(128 << 20, max(16 << 20, 2 * (weight_bytes + act_bytes) + (4 << 20))))

    out = pl.pallas_call(
        affinity_kernel,
        out_shape=jax.ShapeDtypeStruct((B_pad, P), jnp.float32),
        grid=grid,
        in_specs=[
            pl.BlockSpec((TB, D), lambda i: (i, 0)),
            pl.BlockSpec(incw1.shape, rep3),
            pl.BlockSpec(incb1.shape, rep3),
            pl.BlockSpec(incw2.shape, rep3),
            pl.BlockSpec(incb2.shape, rep3),
            pl.BlockSpec(w0.shape, rep2),
            pl.BlockSpec(b0.shape, rep2),
            pl.BlockSpec(wr.shape, rep3),
            pl.BlockSpec(br.shape, rep3),
        ],
        out_specs=pl.BlockSpec((TB, P), lambda i: (i, 0)),
        compiler_params=pltpu.CompilerParams(
            dimension_semantics=("parallel",),
            vmem_limit_bytes=vmem_limit),
        cost_estimate=pl.CostEstimate(
            flops=flops,
            transcendentals=2 * 4 * B_pad * P,
            bytes_accessed=bytes_acc),
    )(x, incw1, incb1, incw2, incb2, w0, b0, wr, br)

    return out[:B, :1]                                         # lane-dense slab -> [B, 1]


def _reference(prot_h, mol_h, raw, use_bf16):
    """Pure-JAX reference (unfused, unpadded weights) mirroring the PyTorch forward
    in eval mode.  use_bf16=True reproduces the kernel's bf16-operand matmul
    numerics (with exact Mish); use_bf16=False is the plain f32 forward."""
    raw_inc, raw_mlp = raw
    mm_dt = jnp.bfloat16 if use_bf16 else jnp.float32
    x = jnp.concatenate([jnp.mean(prot_h, axis=1), jnp.mean(mol_h, axis=1)], axis=-1)
    if use_bf16:
        x = x.astype(jnp.bfloat16).astype(jnp.float32)   # kernel receives bf16 pooled x
    for branches in raw_inc:
        outs = []
        for (W1, b1, W2, b2) in branches:
            y = jnp.maximum(jnp.dot(x.astype(mm_dt), W1.astype(mm_dt),
                                    preferred_element_type=jnp.float32) + b1, 0.0)
            z = jnp.maximum(jnp.dot(y.astype(mm_dt), W2.astype(mm_dt),
                                    preferred_element_type=jnp.float32) + b2, 0.0)
            outs.append(z)
        x = jnp.maximum(jnp.concatenate(outs, axis=-1) + x, 0.0)
    h = x
    for i, (Wt, b) in enumerate(raw_mlp):
        h = jnp.dot(h.astype(mm_dt), Wt.astype(mm_dt),
                    preferred_element_type=jnp.float32) + b
        if i != len(raw_mlp) - 1:
            h = _mish_exact(h)
    return h


if __name__ == "__main__":
    key = jax.random.PRNGKey(0)
    kp, km, kw = jax.random.split(key, 3)

    # small stand-in shapes; combined feature dim D = 64 + 64 = 128 (lane-dense)
    B, Lp, Lm, Dp, Dm = 2, 16, 8, 64, 64
    prot_hidden = jax.random.normal(kp, (B, Lp, Dp), jnp.float32)  # protein last_hidden_state
    mol_hidden = jax.random.normal(km, (B, Lm, Dm), jnp.float32)   # molecule hidden states

    packed, raw = init_params(kw, Dp, Dm)

    out = affinity_predictor(prot_hidden, mol_hidden, packed)
    jax.block_until_ready(out)
    assert out.shape == (B, 1), out.shape

    # tight check vs. a reference with the same bf16-operand numerics
    ref_bf16 = _reference(prot_hidden, mol_hidden, raw, use_bf16=True)
    assert jnp.allclose(out, ref_bf16, atol=5e-3, rtol=5e-3), (out, ref_bf16)

    # looser check vs. the plain f32 forward (bounds total bf16/approx drift)
    ref_f32 = _reference(prot_hidden, mol_hidden, raw, use_bf16=False)
    assert jnp.allclose(out, ref_f32, atol=5e-2, rtol=5e-2), (out, ref_f32)

    print("KERNEL_OK")
</pallas_src>

<mosaic_0001>
module attributes {stable_mosaic.version = 11 : i64} {
  func.func @affinity_kernel(%arg0: i32, %arg1: memref<8x128xbf16, #tpu.memory_space<vmem>>, %arg2: memref<2x128x256xbf16, #tpu.memory_space<vmem>>, %arg3: memref<2x1x256xf32, #tpu.memory_space<vmem>>, %arg4: memref<2x256x128xbf16, #tpu.memory_space<vmem>>, %arg5: memref<2x1x128xf32, #tpu.memory_space<vmem>>, %arg6: memref<128x128xbf16, #tpu.memory_space<vmem>>, %arg7: memref<1x128xf32, #tpu.memory_space<vmem>>, %arg8: memref<4x128x128xbf16, #tpu.memory_space<vmem>>, %arg9: memref<4x1x128xf32, #tpu.memory_space<vmem>>, %arg10: memref<8x128xf32, #tpu.memory_space<vmem>>) attributes {dimension_semantics = [#tpu.dimension_semantics<parallel>], iteration_bounds = array<i64: 1>, scalar_prefetch = 0 : i64, scratch_operands = 0 : i64, tpu.core_type = #tpu.core_type<tc>, window_params = [{transform_indices = @transform_0, window_bounds = array<i64: 8, 128>}, {pipeline_mode = #tpu.pipeline_mode<synchronous>, transform_indices = @transform_1, window_bounds = array<i64: 2, 128, 256>}, {pipeline_mode = #tpu.pipeline_mode<synchronous>, transform_indices = @transform_2, window_bounds = array<i64: 2, 1, 256>}, {pipeline_mode = #tpu.pipeline_mode<synchronous>, transform_indices = @transform_3, window_bounds = array<i64: 2, 256, 128>}, {pipeline_mode = #tpu.pipeline_mode<synchronous>, transform_indices = @transform_4, window_bounds = array<i64: 2, 1, 128>}, {pipeline_mode = #tpu.pipeline_mode<synchronous>, transform_indices = @transform_5, window_bounds = array<i64: 128, 128>}, {pipeline_mode = #tpu.pipeline_mode<synchronous>, transform_indices = @transform_6, window_bounds = array<i64: 1, 128>}, {pipeline_mode = #tpu.pipeline_mode<synchronous>, transform_indices = @transform_7, window_bounds = array<i64: 4, 128, 128>}, {pipeline_mode = #tpu.pipeline_mode<synchronous>, transform_indices = @transform_8, window_bounds = array<i64: 4, 1, 128>}, {transform_indices = @transform_9, window_bounds = array<i64: 8, 128>}]} {
    %c0 = arith.constant 0 : index
    %c0_0 = arith.constant 0 : index
    %0 = vector.load %arg1[%c0, %c0_0] : memref<8x128xbf16, #tpu.memory_space<vmem>>, vector<8x128xbf16>
    %1 = arith.extf %0 : vector<8x128xbf16> to vector<8x128xf32>
    %c0_1 = arith.constant 0 : index
    %c0_2 = arith.constant 0 : index
    %c0_3 = arith.constant 0 : index
    %2 = vector.load %arg2[%c0_1, %c0_2, %c0_3] : memref<2x128x256xbf16, #tpu.memory_space<vmem>>, vector<1x128x256xbf16>
    %3 = vector.shape_cast %2 : vector<1x128x256xbf16> to vector<128x256xbf16>
    %cst = arith.constant dense<0.000000e+00> : vector<8x256xf32>
    %4 = tpu.matmul %0, %3, %cst {dimension_numbers = #tpu.dot_dimension_numbers<[1], [0], [0], [1], [0, 0, 1, 1], [], []>} : vector<8x128xbf16>, vector<128x256xbf16>, vector<8x256xf32> -> vector<8x256xf32>
    %c0_4 = arith.constant 0 : index
    %c0_5 = arith.constant 0 : index
    %c0_6 = arith.constant 0 : index
    %5 = vector.load %arg3[%c0_4, %c0_5, %c0_6] : memref<2x1x256xf32, #tpu.memory_space<vmem>>, vector<1x1x256xf32>
    %6 = vector.shape_cast %5 : vector<1x1x256xf32> to vector<1x256xf32>
    %7 = vector.broadcast %6 : vector<1x256xf32> to vector<8x256xf32>
    %8 = arith.addf %4, %7 : vector<8x256xf32>
    %cst_7 = arith.constant 0.000000e+00 : f32
    %9 = vector.broadcast %cst_7 : f32 to vector<8x256xf32>
    %10 = arith.maximumf %8, %9 : vector<8x256xf32>
    %11 = arith.truncf %10 : vector<8x256xf32> to vector<8x256xbf16>
    %c0_8 = arith.constant 0 : index
    %c0_9 = arith.constant 0 : index
    %c0_10 = arith.constant 0 : index
    %12 = vector.load %arg4[%c0_8, %c0_9, %c0_10] : memref<2x256x128xbf16, #tpu.memory_space<vmem>>, vector<1x256x128xbf16>
    %13 = vector.shape_cast %12 : vector<1x256x128xbf16> to vector<256x128xbf16>
    %cst_11 = arith.constant dense<0.000000e+00> : vector<8x128xf32>
    %14 = tpu.matmul %11, %13, %cst_11 {dimension_numbers = #tpu.dot_dimension_numbers<[1], [0], [0], [1], [0, 0, 1, 1], [], []>} : vector<8x256xbf16>, vector<256x128xbf16>, vector<8x128xf32> -> vector<8x128xf32>
    %c0_12 = arith.constant 0 : index
    %c0_13 = arith.constant 0 : index
    %c0_14 = arith.constant 0 : index
    %15 = vector.load %arg5[%c0_12, %c0_13, %c0_14] : memref<2x1x128xf32, #tpu.memory_space<vmem>>, vector<1x1x128xf32>
    %16 = vector.shape_cast %15 : vector<1x1x128xf32> to vector<1x128xf32>
    %17 = vector.broadcast %16 : vector<1x128xf32> to vector<8x128xf32>
    %18 = arith.addf %14, %17 : vector<8x128xf32>
    %cst_15 = arith.constant 0.000000e+00 : f32
    %19 = vector.broadcast %cst_15 : f32 to vector<8x128xf32>
    %20 = arith.maximumf %18, %19 : vector<8x128xf32>
    %21 = arith.addf %20, %1 : vector<8x128xf32>
    %cst_16 = arith.constant 0.000000e+00 : f32
    %22 = vector.broadcast %cst_16 : f32 to vector<8x128xf32>
    %23 = arith.maximumf %21, %22 : vector<8x128xf32>
    %24 = arith.truncf %23 : vector<8x128xf32> to vector<8x128xbf16>
    %c1 = arith.constant 1 : index
    %c0_17 = arith.constant 0 : index
    %c0_18 = arith.constant 0 : index
    %25 = vector.load %arg2[%c1, %c0_17, %c0_18] : memref<2x128x256xbf16, #tpu.memory_space<vmem>>, vector<1x128x256xbf16>
    %26 = vector.shape_cast %25 : vector<1x128x256xbf16> to vector<128x256xbf16>
    %cst_19 = arith.constant dense<0.000000e+00> : vector<8x256xf32>
    %27 = tpu.matmul %24, %26, %cst_19 {dimension_numbers = #tpu.dot_dimension_numbers<[1], [0], [0], [1], [0, 0, 1, 1], [], []>} : vector<8x128xbf16>, vector<128x256xbf16>, vector<8x256xf32> -> vector<8x256xf32>
    %c1_20 = arith.constant 1 : index
    %c0_21 = arith.constant 0 : index
    %c0_22 = arith.constant 0 : index
    %28 = vector.load %arg3[%c1_20, %c0_21, %c0_22] : memref<2x1x256xf32, #tpu.memory_space<vmem>>, vector<1x1x256xf32>
    %29 = vector.shape_cast %28 : vector<1x1x256xf32> to vector<1x256xf32>
    %30 = vector.broadcast %29 : vector<1x256xf32> to vector<8x256xf32>
    %31 = arith.addf %27, %30 : vector<8x256xf32>
    %cst_23 = arith.constant 0.000000e+00 : f32
    %32 = vector.broadcast %cst_23 : f32 to vector<8x256xf32>
    %33 = arith.maximumf %31, %32 : vector<8x256xf32>
    %34 = arith.truncf %33 : vector<8x256xf32> to vector<8x256xbf16>
    %c1_24 = arith.constant 1 : index
    %c0_25 = arith.constant 0 : index
    %c0_26 = arith.constant 0 : index
    %35 = vector.load %arg4[%c1_24, %c0_25, %c0_26] : memref<2x256x128xbf16, #tpu.memory_space<vmem>>, vector<1x256x128xbf16>
    %36 = vector.shape_cast %35 : vector<1x256x128xbf16> to vector<256x128xbf16>
    %cst_27 = arith.constant dense<0.000000e+00> : vector<8x128xf32>
    %37 = tpu.matmul %34, %36, %cst_27 {dimension_numbers = #tpu.dot_dimension_numbers<[1], [0], [0], [1], [0, 0, 1, 1], [], []>} : vector<8x256xbf16>, vector<256x128xbf16>, vector<8x128xf32> -> vector<8x128xf32>
    %c1_28 = arith.constant 1 : index
    %c0_29 = arith.constant 0 : index
    %c0_30 = arith.constant 0 : index
    %38 = vector.load %arg5[%c1_28, %c0_29, %c0_30] : memref<2x1x128xf32, #tpu.memory_space<vmem>>, vector<1x1x128xf32>
    %39 = vector.shape_cast %38 : vector<1x1x128xf32> to vector<1x128xf32>
    %40 = vector.broadcast %39 : vector<1x128xf32> to vector<8x128xf32>
    %41 = arith.addf %37, %40 : vector<8x128xf32>
    %cst_31 = arith.constant 0.000000e+00 : f32
    %42 = vector.broadcast %cst_31 : f32 to vector<8x128xf32>
    %43 = arith.maximumf %41, %42 : vector<8x128xf32>
    %44 = arith.addf %43, %23 : vector<8x128xf32>
    %cst_32 = arith.constant 0.000000e+00 : f32
    %45 = vector.broadcast %cst_32 : f32 to vector<8x128xf32>
    %46 = arith.maximumf %44, %45 : vector<8x128xf32>
    %47 = arith.truncf %46 : vector<8x128xf32> to vector<8x128xbf16>
    %c0_33 = arith.constant 0 : index
    %c0_34 = arith.constant 0 : index
    %48 = vector.load %arg6[%c0_33, %c0_34] : memref<128x128xbf16, #tpu.memory_space<vmem>>, vector<128x128xbf16>
    %cst_35 = arith.constant dense<0.000000e+00> : vector<8x128xf32>
    %49 = tpu.matmul %47, %48, %cst_35 {dimension_numbers = #tpu.dot_dimension_numbers<[1], [0], [0], [1], [0, 0, 1, 1], [], []>} : vector<8x128xbf16>, vector<128x128xbf16>, vector<8x128xf32> -> vector<8x128xf32>
    %c0_36 = arith.constant 0 : index
    %c0_37 = arith.constant 0 : index
    %50 = vector.load %arg7[%c0_36, %c0_37] : memref<1x128xf32, #tpu.memory_space<vmem>>, vector<1x128xf32>
    %51 = vector.broadcast %50 : vector<1x128xf32> to vector<8x128xf32>
    %52 = arith.addf %49, %51 : vector<8x128xf32>
    %cst_38 = arith.constant 2.000000e+01 : f32
    %53 = vector.broadcast %cst_38 : f32 to vector<8x128xf32>
    %54 = arith.minimumf %52, %53 : vector<8x128xf32>
    %55 = math.exp %54 : vector<8x128xf32>
    %56 = arith.mulf %55, %55 : vector<8x128xf32>
    %cst_39 = arith.constant 2.000000e+00 : f32
    %57 = vector.broadcast %cst_39 : f32 to vector<8x128xf32>
    %58 = arith.mulf %57, %55 : vector<8x128xf32>
    %59 = arith.addf %56, %58 : vector<8x128xf32>
    %60 = arith.mulf %52, %59 : vector<8x128xf32>
    %cst_40 = arith.constant 2.000000e+00 : f32
    %61 = vector.broadcast %cst_40 : f32 to vector<8x128xf32>
    %62 = arith.addf %59, %61 : vector<8x128xf32>
    %63 = tpu.reciprocal %62 {approx = true} : vector<8x128xf32> -> vector<8x128xf32>
    %64 = arith.mulf %60, %63 : vector<8x128xf32>
    %cst_41 = arith.constant 2.000000e+01 : f32
    %65 = vector.broadcast %cst_41 : f32 to vector<8x128xf32>
    %66 = arith.cmpf ogt, %52, %65 : vector<8x128xf32>
    %67 = arith.select %66, %52, %64 : vector<8x128xi1>, vector<8x128xf32>
    %68 = arith.truncf %67 : vector<8x128xf32> to vector<8x128xbf16>
    %c0_42 = arith.constant 0 : index
    %c0_43 = arith.constant 0 : index
    %c0_44 = arith.constant 0 : index
    %69 = vector.load %arg8[%c0_42, %c0_43, %c0_44] : memref<4x128x128xbf16, #tpu.memory_space<vmem>>, vector<1x128x128xbf16>
    %70 = vector.shape_cast %69 : vector<1x128x128xbf16> to vector<128x128xbf16>
    %cst_45 = arith.constant dense<0.000000e+00> : vector<8x128xf32>
    %71 = tpu.matmul %68, %70, %cst_45 {dimension_numbers = #tpu.dot_dimension_numbers<[1], [0], [0], [1], [0, 0, 1, 1], [], []>} : vector<8x128xbf16>, vector<128x128xbf16>, vector<8x128xf32> -> vector<8x128xf32>
    %c0_46 = arith.constant 0 : index
    %c0_47 = arith.constant 0 : index
    %c0_48 = arith.constant 0 : index
    %72 = vector.load %arg9[%c0_46, %c0_47, %c0_48] : memref<4x1x128xf32, #tpu.memory_space<vmem>>, vector<1x1x128xf32>
    %73 = vector.shape_cast %72 : vector<1x1x128xf32> to vector<1x128xf32>
    %74 = vector.broadcast %73 : vector<1x128xf32> to vector<8x128xf32>
    %75 = arith.addf %71, %74 : vector<8x128xf32>
    %cst_49 = arith.constant 2.000000e+01 : f32
    %76 = vector.broadcast %cst_49 : f32 to vector<8x128xf32>
    %77 = arith.minimumf %75, %76 : vector<8x128xf32>
    %78 = math.exp %77 : vector<8x128xf32>
    %79 = arith.mulf %78, %78 : vector<8x128xf32>
    %cst_50 = arith.constant 2.000000e+00 : f32
    %80 = vector.broadcast %cst_50 : f32 to vector<8x128xf32>
    %81 = arith.mulf %80, %78 : vector<8x128xf32>
    %82 = arith.addf %79, %81 : vector<8x128xf32>
    %83 = arith.mulf %75, %82 : vector<8x128xf32>
    %cst_51 = arith.constant 2.000000e+00 : f32
    %84 = vector.broadcast %cst_51 : f32 to vector<8x128xf32>
    %85 = arith.addf %82, %84 : vector<8x128xf32>
    %86 = tpu.reciprocal %85 {approx = true} : vector<8x128xf32> -> vector<8x128xf32>
    %87 = arith.mulf %83, %86 : vector<8x128xf32>
    %cst_52 = arith.constant 2.000000e+01 : f32
    %88 = vector.broadcast %cst_52 : f32 to vector<8x128xf32>
    %89 = arith.cmpf ogt, %75, %88 : vector<8x128xf32>
    %90 = arith.select %89, %75, %87 : vector<8x128xi1>, vector<8x128xf32>
    %91 = arith.truncf %90 : vector<8x128xf32> to vector<8x128xbf16>
    %c1_53 = arith.constant 1 : index
    %c0_54 = arith.constant 0 : index
    %c0_55 = arith.constant 0 : index
    %92 = vector.load %arg8[%c1_53, %c0_54, %c0_55] : memref<4x128x128xbf16, #tpu.memory_space<vmem>>, vector<1x128x128xbf16>
    %93 = vector.shape_cast %92 : vector<1x128x128xbf16> to vector<128x128xbf16>
    %cst_56 = arith.constant dense<0.000000e+00> : vector<8x128xf32>
    %94 = tpu.matmul %91, %93, %cst_56 {dimension_numbers = #tpu.dot_dimension_numbers<[1], [0], [0], [1], [0, 0, 1, 1], [], []>} : vector<8x128xbf16>, vector<128x128xbf16>, vector<8x128xf32> -> vector<8x128xf32>
    %c1_57 = arith.constant 1 : index
    %c0_58 = arith.constant 0 : index
    %c0_59 = arith.constant 0 : index
    %95 = vector.load %arg9[%c1_57, %c0_58, %c0_59] : memref<4x1x128xf32, #tpu.memory_space<vmem>>, vector<1x1x128xf32>
    %96 = vector.shape_cast %95 : vector<1x1x128xf32> to vector<1x128xf32>
    %97 = vector.broadcast %96 : vector<1x128xf32> to vector<8x128xf32>
    %98 = arith.addf %94, %97 : vector<8x128xf32>
    %cst_60 = arith.constant 2.000000e+01 : f32
    %99 = vector.broadcast %cst_60 : f32 to vector<8x128xf32>
    %100 = arith.minimumf %98, %99 : vector<8x128xf32>
    %101 = math.exp %100 : vector<8x128xf32>
    %102 = arith.mulf %101, %101 : vector<8x128xf32>
    %cst_61 = arith.constant 2.000000e+00 : f32
    %103 = vector.broadcast %cst_61 : f32 to vector<8x128xf32>
    %104 = arith.mulf %103, %101 : vector<8x128xf32>
    %105 = arith.addf %102, %104 : vector<8x128xf32>
    %106 = arith.mulf %98, %105 : vector<8x128xf32>
    %cst_62 = arith.constant 2.000000e+00 : f32
    %107 = vector.broadcast %cst_62 : f32 to vector<8x128xf32>
    %108 = arith.addf %105, %107 : vector<8x128xf32>
    %109 = tpu.reciprocal %108 {approx = true} : vector<8x128xf32> -> vector<8x128xf32>
    %110 = arith.mulf %106, %109 : vector<8x128xf32>
    %cst_63 = arith.constant 2.000000e+01 : f32
    %111 = vector.broadcast %cst_63 : f32 to vector<8x128xf32>
    %112 = arith.cmpf ogt, %98, %111 : vector<8x128xf32>
    %113 = arith.select %112, %98, %110 : vector<8x128xi1>, vector<8x128xf32>
    %114 = arith.truncf %113 : vector<8x128xf32> to vector<8x128xbf16>
    %c2 = arith.constant 2 : index
    %c0_64 = arith.constant 0 : index
    %c0_65 = arith.constant 0 : index
    %115 = vector.load %arg8[%c2, %c0_64, %c0_65] : memref<4x128x128xbf16, #tpu.memory_space<vmem>>, vector<1x128x128xbf16>
    %116 = vector.shape_cast %115 : vector<1x128x128xbf16> to vector<128x128xbf16>
    %cst_66 = arith.constant dense<0.000000e+00> : vector<8x128xf32>
    %117 = tpu.matmul %114, %116, %cst_66 {dimension_numbers = #tpu.dot_dimension_numbers<[1], [0], [0], [1], [0, 0, 1, 1], [], []>} : vector<8x128xbf16>, vector<128x128xbf16>, vector<8x128xf32> -> vector<8x128xf32>
    %c2_67 = arith.constant 2 : index
    %c0_68 = arith.constant 0 : index
    %c0_69 = arith.constant 0 : index
    %118 = vector.load %arg9[%c2_67, %c0_68, %c0_69] : memref<4x1x128xf32, #tpu.memory_space<vmem>>, vector<1x1x128xf32>
    %119 = vector.shape_cast %118 : vector<1x1x128xf32> to vector<1x128xf32>
    %120 = vector.broadcast %119 : vector<1x128xf32> to vector<8x128xf32>
    %121 = arith.addf %117, %120 : vector<8x128xf32>
    %cst_70 = arith.constant 2.000000e+01 : f32
    %122 = vector.broadcast %cst_70 : f32 to vector<8x128xf32>
    %123 = arith.minimumf %121, %122 : vector<8x128xf32>
    %124 = math.exp %123 : vector<8x128xf32>
    %125 = arith.mulf %124, %124 : vector<8x128xf32>
    %cst_71 = arith.constant 2.000000e+00 : f32
    %126 = vector.broadcast %cst_71 : f32 to vector<8x128xf32>
    %127 = arith.mulf %126, %124 : vector<8x128xf32>
    %128 = arith.addf %125, %127 : vector<8x128xf32>
    %129 = arith.mulf %121, %128 : vector<8x128xf32>
    %cst_72 = arith.constant 2.000000e+00 : f32
    %130 = vector.broadcast %cst_72 : f32 to vector<8x128xf32>
    %131 = arith.addf %128, %130 : vector<8x128xf32>
    %132 = tpu.reciprocal %131 {approx = true} : vector<8x128xf32> -> vector<8x128xf32>
    %133 = arith.mulf %129, %132 : vector<8x128xf32>
    %cst_73 = arith.constant 2.000000e+01 : f32
    %134 = vector.broadcast %cst_73 : f32 to vector<8x128xf32>
    %135 = arith.cmpf ogt, %121, %134 : vector<8x128xf32>
    %136 = arith.select %135, %121, %133 : vector<8x128xi1>, vector<8x128xf32>
    %137 = arith.truncf %136 : vector<8x128xf32> to vector<8x128xbf16>
    %c3 = arith.constant 3 : index
    %c0_74 = arith.constant 0 : index
    %c0_75 = arith.constant 0 : index
    %138 = vector.load %arg8[%c3, %c0_74, %c0_75] : memref<4x128x128xbf16, #tpu.memory_space<vmem>>, vector<1x128x128xbf16>
    %139 = vector.shape_cast %138 : vector<1x128x128xbf16> to vector<128x128xbf16>
    %cst_76 = arith.constant dense<0.000000e+00> : vector<8x128xf32>
    %140 = tpu.matmul %137, %139, %cst_76 {dimension_numbers = #tpu.dot_dimension_numbers<[1], [0], [0], [1], [0, 0, 1, 1], [], []>} : vector<8x128xbf16>, vector<128x128xbf16>, vector<8x128xf32> -> vector<8x128xf32>
    %c3_77 = arith.constant 3 : index
    %c0_78 = arith.constant 0 : index
    %c0_79 = arith.constant 0 : index
    %141 = vector.load %arg9[%c3_77, %c0_78, %c0_79] : memref<4x1x128xf32, #tpu.memory_space<vmem>>, vector<1x1x128xf32>
    %142 = vector.shape_cast %141 : vector<1x1x128xf32> to vector<1x128xf32>
    %143 = vector.broadcast %142 : vector<1x128xf32> to vector<8x128xf32>
    %144 = arith.addf %140, %143 : vector<8x128xf32>
    %c0_80 = arith.constant 0 : index
    %c0_81 = arith.constant 0 : index
    %145 = vector.load %arg10[%c0_80, %c0_81] : memref<8x128xf32, #tpu.memory_space<vmem>>, vector<8x128xf32>
    tpu.vector_store %arg10[%c0_80, %c0_81], %144 {strides = array<i32>} : memref<8x128xf32, #tpu.memory_space<vmem>>, vector<8x128xf32>,
    return
  }
  func.func @transform_0(%arg0: i32) -> (i32, i32) {
    %c0_i32 = arith.constant 0 : i32
    %c0_i32_0 = arith.constant 0 : i32
    return %arg0, %c0_i32 : i32, i32
  }
  func.func @transform_1(%arg0: i32) -> (i32, i32, i32) {
    %c0_i32 = arith.constant 0 : i32
    %c0_i32_0 = arith.constant 0 : i32
    %c0_i32_1 = arith.constant 0 : i32
    %c0_i32_2 = arith.constant 0 : i32
    return %c0_i32, %c0_i32_0, %c0_i32_1 : i32, i32, i32
  }
  func.func @transform_2(%arg0: i32) -> (i32, i32, i32) {
    %c0_i32 = arith.constant 0 : i32
    %c0_i32_0 = arith.constant 0 : i32
    %c0_i32_1 = arith.constant 0 : i32
    %c0_i32_2 = arith.constant 0 : i32
    return %c0_i32, %c0_i32_0, %c0_i32_1 : i32, i32, i32
  }
  func.func @transform_3(%arg0: i32) -> (i32, i32, i32) {
    %c0_i32 = arith.constant 0 : i32
    %c0_i32_0 = arith.constant 0 : i32
    %c0_i32_1 = arith.constant 0 : i32
    %c0_i32_2 = arith.constant 0 : i32
    return %c0_i32, %c0_i32_0, %c0_i32_1 : i32, i32, i32
  }
  func.func @transform_4(%arg0: i32) -> (i32, i32, i32) {
    %c0_i32 = arith.constant 0 : i32
    %c0_i32_0 = arith.constant 0 : i32
    %c0_i32_1 = arith.constant 0 : i32
    %c0_i32_2 = arith.constant 0 : i32
    return %c0_i32, %c0_i32_0, %c0_i32_1 : i32, i32, i32
  }
  func.func @transform_5(%arg0: i32) -> (i32, i32) {
    %c0_i32 = arith.constant 0 : i32
    %c0_i32_0 = arith.constant 0 : i32
    %c0_i32_1 = arith.constant 0 : i32
    return %c0_i32, %c0_i32_0 : i32, i32
  }
  func.func @transform_6(%arg0: i32) -> (i32, i32) {
    %c0_i32 = arith.constant 0 : i32
    %c0_i32_0 = arith.constant 0 : i32
    %c0_i32_1 = arith.constant 0 : i32
    return %c0_i32, %c0_i32_0 : i32, i32
  }
  func.func @transform_7(%arg0: i32) -> (i32, i32, i32) {
    %c0_i32 = arith.constant 0 : i32
    %c0_i32_0 = arith.constant 0 : i32
    %c0_i32_1 = arith.constant 0 : i32
    %c0_i32_2 = arith.constant 0 : i32
    return %c0_i32, %c0_i32_0, %c0_i32_1 : i32, i32, i32
  }
  func.func @transform_8(%arg0: i32) -> (i32, i32, i32) {
    %c0_i32 = arith.constant 0 : i32
    %c0_i32_0 = arith.constant 0 : i32
    %c0_i32_1 = arith.constant 0 : i32
    %c0_i32_2 = arith.constant 0 : i32
    return %c0_i32, %c0_i32_0, %c0_i32_1 : i32, i32, i32
  }
  func.func @transform_9(%arg0: i32) -> (i32, i32) {
    %c0_i32 = arith.constant 0 : i32
    %c0_i32_0 = arith.constant 0 : i32
    return %arg0, %c0_i32 : i32, i32
  }
}

</mosaic_0001>

<bundles_post_ra>
// kernel: affinity_predictor.1
= control target key start
LH: loop header
LB: loop body
LE: loop exit
PB: predicated region body
PF: predicated region fallthrough
CT: control target
= control target key end

     0   :  { %14 = vsyncpa [#allocation3], 0  ;;  %s1992_s0 = inlined_call_operand.vmem [shape: bf16[8,128], index: 0, kind: input, shape index: {}]   ;;  %s1993_s1 = inlined_call_operand.hbm [shape: bf16[2,128,256], index: 1, kind: input, shape index: {}]   ;;  %s1994_s2 = inlined_call_operand.vmem [shape: f32[2,1,256], index: 2, kind: input, shape index: {}]   ;;  %s1995_s3 = inlined_call_operand.hbm [shape: bf16[2,256,128], index: 3, kind: input, shape index: {}]   ;;  %s1996_s4 = inlined_call_operand.hbm [shape: f32[2,1,128], index: 4, kind: input, shape index: {}]   ;;  %s1997_s5 = inlined_call_operand.vmem [shape: bf16[128,128], index: 5, kind: input, shape index: {}]   ;;  %s1998_s6 = inlined_call_operand.hbm [shape: f32[1,128], index: 6, kind: input, shape index: {}]   ;;  %s1999_s7 = inlined_call_operand.hbm [shape: bf16[4,128,128], index: 7, kind: input, shape index: {}]   ;;  %s2000_s8 = inlined_call_operand.vmem [shape: f32[4,1,128], index: 8, kind: input, shape index: {}]   ;;  %s2001_s9 = inlined_call_operand.vmem [shape: f32[8,128], index: 9, kind: output, shape index: {}]  }
   0x1   :  { %15 = vsyncpa [#allocation5], 0  ;;  %s38_s11 = sshll.u32 %s1995_s3, 4  ;;  %s39_s11 = int_to_ptr.hbm [resolvable:$true] %s38_s11 }
   0x2   :  { %16 = vsyncpa [#allocation8], 0  ;;  %s1857_s12 = smov [#allocation4]   ;;  %s67_s16 = sshll.u32 %s1998_s6, 4  ;;  %s68_s16 = int_to_ptr.hbm [resolvable:$true] %s67_s16 }
   0x3   :  { %s40_s13 = sshll.u32 %s1857_s12, 4  ;;  %s1858_s17 = smov 64   ;;  %s41_s13 = int_to_ptr.vmem [resolvable:$true] %s40_s13 }
   0x4   :  { %s1859_s18 = smov 4   ;;  %s1860_s19 = smov [#allocation7]  }
   0x5   :  { %46 = dma.hbm_to_vmem [thread:$0]  %s39_s11, 4096, %s41_s13, [#allocation5], %s1858_s17, %s1858_s17, %s1859_s18  }
   0x6   :  { %s69_s20 = sshll.u32 %s1860_s19, 4  ;;  %s23_s22 = sshll.u32 %s1993_s1, 4  ;;  %s70_s20 = int_to_ptr.vmem [resolvable:$true] %s69_s20  ;;  %s24_s22 = int_to_ptr.hbm [resolvable:$true] %s23_s22 }
   0x7   :  { %72 = dma.hbm_to_vmem [thread:$0]  %s68_s16, 16, %s70_s20, [#allocation8]  }
   0x8   :  { %s1861_s23 = smov [#allocation2]   ;;  %s51_s26 = sshll.u32 %s1996_s4, 4  ;;  %s52_s26 = int_to_ptr.hbm [resolvable:$true] %s51_s26 }
   0x9   :  { %s25_s24 = sshll.u32 %s1861_s23, 4  ;;  %s1862_s27 = smov 128   ;;  %s26_s24 = int_to_ptr.vmem [resolvable:$true] %s25_s24 }
   0xa   :  { %s1863_s28 = smov 8   ;;  %s1864_s29 = smov [#allocation6]  }
   0xb   :  { %31 = dma.hbm_to_vmem [thread:$0]  %s24_s22, 4096, %s26_s24, [#allocation3], %s1862_s27, %s1862_s27, %s1863_s28  }
   0xc   :  { %s53_s30 = sshll.u32 %s1864_s29, 4  ;;  %s1865_s10 = smov 16   ;;  %s54_s30 = int_to_ptr.vmem [resolvable:$true] %s53_s30 }
   0xd   :  { %s1866_s11 = smov 1   ;;  %s77_s13 = sshll.u32 %s1999_s7, 4  ;;  %s78_s13 = int_to_ptr.hbm [resolvable:$true] %s77_s13 }
   0xe   :  { %59 = dma.hbm_to_vmem [thread:$0]  %s52_s26, 32, %s54_s30, [#allocation5], %s1865_s10, %s1865_s10, %s1866_s11  }
   0xf   :  { %s1867_s14 = smov [#allocation9]  }
  0x10   :  { %s79_s15 = sshll.u32 %s1867_s14, 4  ;;  %s80_s15 = int_to_ptr.vmem [resolvable:$true] %s79_s15 }
  0x11   :  { %85 = dma.hbm_to_vmem [thread:$0]  %s78_s13, 4096, %s80_s15, [#allocation8], %s1858_s17, %s1858_s17, %s1859_s18  }
  0x12   :  { %1851 = dma.done.wait [#allocation3], 4096  }
  0x13   :  { %1852 = vsyncadd [#allocation3], 4294963200 }
  0x14   :  { %1853 = dma.done.wait [#allocation5], 4128  }
  0x15   :  { %1854 = vsyncadd [#allocation5], 4294963168 }
  0x16   :  { %1855 = dma.done.wait [#allocation8], 4112  }
  0x17   :  { %1856 = vsyncadd [#allocation8], 4294963184  ;;  %v1231_v0 = vld [vmem:[#allocation2 + $0x70] sm:$0xf]  ;;  %v1608_v1 = vld [vmem:[#allocation2 + $0x74] sm:$0xf0] }
  0x18   :  { %v1607_v2 = vld [vmem:[#allocation2 + $0x74] sm:$0xf]  ;;  %v1232_v3 = vor.u32 %v1608_v1, %v1231_v0  ;;  %v1233_v4 = vld [vmem:[#allocation2 + $0x78] sm:$0xf0]  ;;  %v1223_v5 = vld [vmem:[#allocation2 + $0x60] sm:$0xf] }
  0x19   :  { %v1606_v6 = vld [vmem:[#allocation2 + $0x64] sm:$0xf0]  ;;  %v1236_v7 = vor.u32 %v1607_v2, %v1233_v4  ;;  %v1605_v8 = vld [vmem:[#allocation2 + $0x64] sm:$0xf]  ;;  %v1225_v9 = vld [vmem:[#allocation2 + $0x68] sm:$0xf0] }
  0x1a   :  { %212 = vmatpush.bf16.msra.mxu0 %v1232_v3  ;;  %v1224_v10 = vor.u32 %v1606_v6, %v1223_v5  ;;  %v1228_v11 = vor.u32 %v1605_v8, %v1225_v9  ;;  %v1215_v12 = vld [vmem:[#allocation2 + $0x50] sm:$0xf]  ;;  %v1604_v13 = vld [vmem:[#allocation2 + $0x54] sm:$0xf0]  ;;  %v1603_v14 = vld [vmem:[#allocation2 + $0x54] sm:$0xf] }
  0x1b   :  { %225 = vmatpush.bf16.msra.mxu1 %v1236_v7  ;;  %v1217_v15 = vld [vmem:[#allocation2 + $0x58] sm:$0xf0]  ;;  %v1216_v16 = vor.u32 %v1604_v13, %v1215_v12  ;;  %v1207_v18 = vld [vmem:[#allocation2 + $0x40] sm:$0xf]  ;;  %v1602_v19 = vld [vmem:[#allocation2 + $0x44] sm:$0xf0] }
  0x1c   :  { %v1220_v17 = vor.u32 %v1603_v14, %v1217_v15  ;;  %v1601_v20 = vld [vmem:[#allocation2 + $0x44] sm:$0xf]  ;;  %v1209_v21 = vld [vmem:[#allocation2 + $0x48] sm:$0xf0]  ;;  %v1208_v22 = vor.u32 %v1602_v19, %v1207_v18  ;;  %v1616_v23 = vld [vmem:[#allocation4 + $0x38] sm:$0xff] }
  0x1d   :  { %v1624_v24 = vld [vmem:[#allocation4 + $0x78] sm:$0xff]  ;;  %v1212_v25 = vor.u32 %v1601_v20, %v1209_v21  ;;  %v1199_v26 = vld [vmem:[#allocation2 + $0x30] sm:$0xf]  ;;  %v1599_v28 = vld [vmem:[#allocation2 + $0x34] sm:$0xf]  ;;  %374 = vmatpush.bf16.msra.mxu2 %v1616_v23 }
  0x1e   :  { %213 = vmatpush.bf16.msra.mxu0 %v1224_v10  ;;  %v1600_v27 = vld [vmem:[#allocation2 + $0x34] sm:$0xf0]  ;;  %v1201_v29 = vld [vmem:[#allocation2 + $0x38] sm:$0xf0]  ;;  %387 = vmatpush.bf16.msra.mxu3 %v1624_v24  ;;  %v1615_v30 = vld [vmem:[#allocation4 + $0x30] sm:$0xff] }
  0x1f   :  { %226 = vmatpush.bf16.msra.mxu1 %v1228_v11  ;;  %v1623_v31 = vld [vmem:[#allocation4 + $0x70] sm:$0xff]  ;;  %v1191_v32 = vld [vmem:[#allocation2 + $0x20] sm:$0xf]  ;;  %v1598_v33 = vld [vmem:[#allocation2 + $0x24] sm:$0xf0]  ;;  %v1200_v34 = vor.u32 %v1600_v27, %v1199_v26  ;;  %v1204_v38 = vor.u32 %v1599_v28, %v1201_v29 }
  0x20   :  { %v1597_v35 = vld [vmem:[#allocation2 + $0x24] sm:$0xf]  ;;  %v1193_v36 = vld [vmem:[#allocation2 + $0x28] sm:$0xf0]  ;;  %v1192_v40 = vor.u32 %v1598_v33, %v1191_v32  ;;  %v1183_v42 = vld [vmem:[#allocation2 + $0x10] sm:$0xf] }
  0x21   :  { %v1614_v37 = vld [vmem:[#allocation4 + $0x28] sm:$0xff]  ;;  %375 = vmatpush.bf16.msra.mxu2 %v1615_v30  ;;  %v1196_v41 = vor.u32 %v1597_v35, %v1193_v36  ;;  %v1596_v43 = vld [vmem:[#allocation2 + $0x14] sm:$0xf0]  ;;  %v1595_v44 = vld [vmem:[#allocation2 + $0x14] sm:$0xf] }
  0x22   :  { %214 = vmatpush.bf16.msra.mxu0 %v1216_v16  ;;  %v1622_v39 = vld [vmem:[#allocation4 + $0x68] sm:$0xff]  ;;  %388 = vmatpush.bf16.msra.mxu3 %v1623_v31  ;;  %v1185_v45 = vld [vmem:[#allocation2 + $0x18] sm:$0xf0]  ;;  %v1613_v46 = vld [vmem:[#allocation4 + $0x20] sm:$0xff]  ;;  %v1184_v48 = vor.u32 %v1596_v43, %v1183_v42 }
  0x23   :  { %227 = vmatpush.bf16.msra.mxu1 %v1220_v17  ;;  %v1621_v47 = vld [vmem:[#allocation4 + $0x60] sm:$0xff]  ;;  %v1188_v49 = vor.u32 %v1595_v44, %v1185_v45  ;;  %v1594_v51 = vld [vmem:[#allocation2 + $0x4] sm:$0xf0]  ;;  %v1177_v53 = vld [vmem:[#allocation2 + $0x8] sm:$0xf0] }
  0x24   :  { %v1175_v50 = vld [vmem:[#allocation2] sm:$0xf]  ;;  %v1593_v52 = vld [vmem:[#allocation2 + $0x4] sm:$0xf]  ;;  %v1612_v54 = vld [vmem:[#allocation4 + $0x18] sm:$0xff] }
  0x25   :  { %376 = vmatpush.bf16.msra.mxu2 %v1614_v37  ;;  %v1620_v55 = vld [vmem:[#allocation4 + $0x58] sm:$0xff]  ;;  %v1176_v56 = vor.u32 %v1594_v51, %v1175_v50  ;;  %v1180_v57 = vor.u32 %v1593_v52, %v1177_v53  ;;  %v1611_v58 = vld [vmem:[#allocation4 + $0x10] sm:$0xff]  ;;  %v1942_v60 = vld [vmem:[%s1992_s0] sm:$0xf] }
  0x26   :  { %215 = vmatpush.bf16.msra.mxu0 %v1208_v22  ;;  %389 = vmatpush.bf16.msra.mxu3 %v1622_v39  ;;  %v1619_v59 = vld [vmem:[#allocation4 + $0x50] sm:$0xff]  ;;  %v1610_v61 = vld [vmem:[#allocation4 + $0x8] sm:$0xff]  ;;  %v1609_v63 = vld [vmem:[#allocation4] sm:$0xff] }
  0x27   :  { %228 = vmatpush.bf16.msra.mxu1 %v1212_v25  ;;  %v1618_v62 = vld [vmem:[#allocation4 + $0x48] sm:$0xff]  ;;  %v1617_v0 = vld [vmem:[#allocation4 + $0x40] sm:$0xff]  ;;  %v1360_v1 = vld [vmem:[#allocation2 + $0xf0] sm:$0xf] }
  0x28   :  { %v1640_v2 = vld [vmem:[#allocation2 + $0xf4] sm:$0xf0]  ;;  %v1639_v3 = vld [vmem:[#allocation2 + $0xf4] sm:$0xf]  ;;  %v1362_v5 = vld [vmem:[#allocation2 + $0xf8] sm:$0xf0] }
  0x29   :  { %377 = vmatpush.bf16.msra.mxu2 %v1613_v46  ;;  %v1361_v4 = vor.u32 %v1640_v2, %v1360_v1  ;;  %v1352_v6 = vld [vmem:[#allocation2 + $0xe0] sm:$0xf]  ;;  %v1638_v7 = vld [vmem:[#allocation2 + $0xe4] sm:$0xf0]  ;;  %v1365_v8 = vor.u32 %v1639_v3, %v1362_v5  ;;  %v1637_v9 = vld [vmem:[#allocation2 + $0xe4] sm:$0xf] }
  0x2a   :  { %216 = vmatpush.bf16.msra.mxu0 %v1200_v34  ;;  %390 = vmatpush.bf16.msra.mxu3 %v1621_v47  ;;  %v1354_v10 = vld [vmem:[#allocation2 + $0xe8] sm:$0xf0]  ;;  %v1353_v11 = vor.u32 %v1638_v7, %v1352_v6  ;;  %v1344_v13 = vld [vmem:[#allocation2 + $0xd0] sm:$0xf]  ;;  %v1636_v14 = vld [vmem:[#allocation2 + $0xd4] sm:$0xf0] }
  0x2b   :  { %229 = vmatpush.bf16.msra.mxu1 %v1204_v38  ;;  %v1357_v12 = vor.u32 %v1637_v9, %v1354_v10  ;;  %v1635_v15 = vld [vmem:[#allocation2 + $0xd4] sm:$0xf]  ;;  %v1346_v16 = vld [vmem:[#allocation2 + $0xd8] sm:$0xf0]  ;;  %v1345_v17 = vor.u32 %v1636_v14, %v1344_v13  ;;  %v1336_v19 = vld [vmem:[#allocation2 + $0xc0] sm:$0xf] }
  0x2c   :  { %v1349_v18 = vor.u32 %v1635_v15, %v1346_v16  ;;  %v1634_v20 = vld [vmem:[#allocation2 + $0xc4] sm:$0xf0]  ;;  %v1633_v21 = vld [vmem:[#allocation2 + $0xc4] sm:$0xf]  ;;  %v1338_v22 = vld [vmem:[#allocation2 + $0xc8] sm:$0xf0]  ;;  %v109_v15 = vunpack.c.l.bf16 %v1942_v60 }
  0x2d   :  { %378 = vmatpush.bf16.msra.mxu2 %v1612_v54  ;;  %v1337_v23 = vor.u32 %v1634_v20, %v1336_v19  ;;  %v1341_v24 = vor.u32 %v1633_v21, %v1338_v22  ;;  %v1328_v25 = vld [vmem:[#allocation2 + $0xb0] sm:$0xf]  ;;  %v1632_v26 = vld [vmem:[#allocation2 + $0xb4] sm:$0xf0]  ;;  %v1631_v27 = vld [vmem:[#allocation2 + $0xb4] sm:$0xf] }
  0x2e   :  { %217 = vmatpush.bf16.msra.mxu0 %v1192_v40  ;;  %391 = vmatpush.bf16.msra.mxu3 %v1620_v55  ;;  %v1330_v28 = vld [vmem:[#allocation2 + $0xb8] sm:$0xf0]  ;;  %v1329_v29 = vor.u32 %v1632_v26, %v1328_v25  ;;  %v126_v31 = vld [vmem:[%s1994_s2] sm:$0x3]  ;;  %v1630_v45 = vld [vmem:[#allocation2 + $0xa4] sm:$0xf0] }
  0x2f   :  { %230 = vmatpush.bf16.msra.mxu1 %v1196_v41  ;;  %v1333_v30 = vor.u32 %v1631_v27, %v1330_v28  ;;  %v128_v32 = vperm.slane %v126_v31, 0  ;;  %v129_v33 = vperm.slane %v126_v31, 1  ;;  %v1320_v44 = vld [vmem:[#allocation2 + $0xa0] sm:$0xf]  ;;  %v1629_v46 = vld [vmem:[#allocation2 + $0xa4] sm:$0xf] }
  0x30   :  { %v1321_v47 = vor.u32 %v1630_v45, %v1320_v44  ;;  %v1312_v50 = vld [vmem:[#allocation2 + $0x90] sm:$0xf]  ;;  %v1628_v51 = vld [vmem:[#allocation2 + $0x94] sm:$0xf0]  ;;  %v1627_v52 = vld [vmem:[#allocation2 + $0x94] sm:$0xf] }
  0x31   :  { %379 = vmatpush.bf16.msra.mxu2 %v1611_v58  ;;  %v1313_v53 = vor.u32 %v1628_v51, %v1312_v50  ;;  %v1314_v54 = vld [vmem:[#allocation2 + $0x98] sm:$0xf0]  ;;  %v1625_v58 = vld [vmem:[#allocation2 + $0x84] sm:$0xf]  ;;  %v1647_v1 = vld [vmem:[#allocation4 + $0xb0] sm:$0xff] }
  0x32   :  { %218 = vmatpush.bf16.msra.mxu0 %v1184_v48  ;;  %392 = vmatpush.bf16.msra.mxu3 %v1619_v59  ;;  %v1322_v48 = vld [vmem:[#allocation2 + $0xa8] sm:$0xf0]  ;;  %v1317_v55 = vor.u32 %v1627_v52, %v1314_v54  ;;  %v1655_v2 = vld [vmem:[#allocation4 + $0xf0] sm:$0xff]  ;;  %v1645_v5 = vld [vmem:[#allocation4 + $0xa0] sm:$0xff] }
  0x33   :  { %231 = vmatpush.bf16.msra.mxu1 %v1188_v49  ;;  %v1325_v49 = vor.u32 %v1629_v46, %v1322_v48  ;;  %v1646_v3 = vld [vmem:[#allocation4 + $0xa8] sm:$0xff]  ;;  %v1653_v6 = vld [vmem:[#allocation4 + $0xe0] sm:$0xff]  ;;  %v1644_v7 = vld [vmem:[#allocation4 + $0x98] sm:$0xff] }
  0x34   :  { %v1708_v9 = vld [vmem:[#allocation6] ss:$0 sm:$0xff]  ;;  %v1643_v10 = vld [vmem:[#allocation4 + $0x90] sm:$0xff]  ;;  %v1662_v28 = vld [vmem:[%s1997_s5 + $0x28] sm:$0xff] }
  0x35   :  { %380 = vmatpush.bf16.msra.mxu2 %v1610_v61  ;;  %v1306_v61 = vld [vmem:[#allocation2 + $0x88] sm:$0xf0]  ;;  %v1641_v25 = vld [vmem:[#allocation4 + $0x80] sm:$0xff]  ;;  %v1663_v27 = vld [vmem:[%s1997_s5 + $0x30] sm:$0xff] }
  0x36   :  { %219 = vmatpush.bf16.msra.mxu0 %v1176_v56  ;;  %393 = vmatpush.bf16.msra.mxu3 %v1618_v62  ;;  %v1304_v56 = vld [vmem:[#allocation2 + $0x80] sm:$0xf]  ;;  %v1309_v62 = vor.u32 %v1625_v58, %v1306_v61  ;;  %v1659_v44 = vld [vmem:[%s1997_s5 + $0x10] sm:$0xff]  ;;  %v1658_v45 = vld [vmem:[%s1997_s5 + $0x8] sm:$0xff] }
  0x37   :  { %232 = vmatpush.bf16.msra.mxu1 %v1180_v57  ;;  %v1626_v57 = vld [vmem:[#allocation2 + $0x84] sm:$0xf0]  ;;  %v1649_v26 = vld [vmem:[#allocation4 + $0xc0] sm:$0xff]  ;;  %v1670_v61 = vld [vmem:[#allocation9 + $0x28] sm:$0xff] }
  0x38   :  { %v1305_v59 = vor.u32 %v1626_v57, %v1304_v56  ;;  %v1301_v31 = vld [vmem:[%s1994_s2 + $0x2] sm:$0x3] }
  0x39   :  { %220 = vmatmul.bf16.vlgmr.msra.gmra.mxu0 %v1942_v60  ;;  %381 = vmatpush.bf16.msra.mxu2 %v1609_v63  ;;  %v1648_v63 = vld [vmem:[#allocation4 + $0xb8] sm:$0xff]  ;;  %v1657_v46 = vld [vmem:[%s1997_s5] sm:$0xff] }
  0x3a   :  { %233 = vmatmul.bf16.vlgmr.msra.gmra.mxu1 %v1942_v60  ;;  %394 = vmatpush.bf16.msra.mxu3 %v1617_v0  ;;  %v1656_v0 = vld [vmem:[#allocation4 + $0xf8] sm:$0xff] }
  0x3b   :  { %508 = vmatpush.bf16.msrb.mxu0 %v1361_v4  ;;  %521 = vmatpush.bf16.msrb.mxu1 %v1365_v8  ;;  %v1654_v4 = vld [vmem:[#allocation4 + $0xe8] sm:$0xff]  ;;  %v1652_v8 = vld [vmem:[#allocation4 + $0xd8] sm:$0xff] }
  0x3c   :  { %v1664_v60 = vld [vmem:[%s1997_s5 + $0x38] sm:$0xff] }
  0x3d   :  { %672 = vmatpush.bf16.msrb.mxu2 %v1648_v63  ;;  %v1672_v58 = vld [vmem:[#allocation9 + $0x38] sm:$0xff] }
  0x3e   :  { %685 = vmatpush.bf16.msrb.mxu3 %v1656_v0  ;;  %v1668_v63 = vld [vmem:[#allocation9 + $0x18] sm:$0xff]  ;;  %v1667_v0 = vld [vmem:[#allocation9 + $0x10] sm:$0xff] }
  0x3f   :  { %509 = vmatpush.bf16.msrb.mxu0 %v1353_v11  ;;  %522 = vmatpush.bf16.msrb.mxu1 %v1357_v12  ;;  %v1651_v11 = vld [vmem:[#allocation4 + $0xd0] sm:$0xff] }
  0x41   :  { %673 = vmatpush.bf16.msrb.mxu2 %v1647_v1  ;;  %v1666_v1 = vld [vmem:[#allocation9 + $0x8] sm:$0xff] }
  0x42   :  { %686 = vmatpush.bf16.msrb.mxu3 %v1655_v2  ;;  %v1665_v2 = vld [vmem:[#allocation9] sm:$0xff] }
  0x43   :  { %510 = vmatpush.bf16.msrb.mxu0 %v1345_v17  ;;  %523 = vmatpush.bf16.msrb.mxu1 %v1349_v18 }
  0x45   :  { %674 = vmatpush.bf16.msrb.mxu2 %v1646_v3  ;;  %v1710_v3 = vld [vmem:[#allocation7] ss:$0 sm:$0xff] }
  0x46   :  { %687 = vmatpush.bf16.msrb.mxu3 %v1654_v4 }
  0x47   :  { %511 = vmatpush.bf16.msrb.mxu0 %v1337_v23  ;;  %524 = vmatpush.bf16.msrb.mxu1 %v1341_v24  ;;  %v1642_v23 = vld [vmem:[#allocation4 + $0x88] sm:$0xff] }
  0x48   :  { %v1650_v24 = vld [vmem:[#allocation4 + $0xc8] sm:$0xff] }
  0x49   :  { %675 = vmatpush.bf16.msrb.mxu2 %v1645_v5 }
  0x4a   :  { %688 = vmatpush.bf16.msrb.mxu3 %v1653_v6 }
  0x4b   :  { %512 = vmatpush.bf16.msrb.mxu0 %v1329_v29  ;;  %525 = vmatpush.bf16.msrb.mxu1 %v1333_v30  ;;  %v1661_v29 = vld [vmem:[%s1997_s5 + $0x20] sm:$0xff]  ;;  %v1660_v30 = vld [vmem:[%s1997_s5 + $0x18] sm:$0xff] }
  0x4d   :  { %676 = vmatpush.bf16.msrb.mxu2 %v1644_v7 }
  0x4e   :  { %689 = vmatpush.bf16.msrb.mxu3 %v1652_v8 }
  0x4f   :  { %513 = vmatpush.bf16.msrb.mxu0 %v1321_v47  ;;  %526 = vmatpush.bf16.msrb.mxu1 %v1325_v49  ;;  %v1709_v47 = vld [vmem:[#allocation6 + $0x1] ss:$0 sm:$0xff] }
  0x51   :  { %677 = vmatpush.bf16.msrb.mxu2 %v1643_v10 }
  0x52   :  { %690 = vmatpush.bf16.msrb.mxu3 %v1651_v11 }
  0x53   :  { %514 = vmatpush.bf16.msrb.mxu0 %v1313_v53  ;;  %527 = vmatpush.bf16.msrb.mxu1 %v1317_v55 }
  0x55   :  { %678 = vmatpush.bf16.msrb.mxu2 %v1642_v23  ;;  %v1676_v23 = vld [vmem:[#allocation9 + $0x58] sm:$0xff] }
  0x56   :  { %691 = vmatpush.bf16.msrb.mxu3 %v1650_v24  ;;  %v1675_v24 = vld [vmem:[#allocation9 + $0x50] sm:$0xff] }
  0x57   :  { %515 = vmatpush.bf16.msrb.mxu0 %v1305_v59  ;;  %528 = vmatpush.bf16.msrb.mxu1 %v1309_v62  ;;  %v1671_v59 = vld [vmem:[#allocation9 + $0x30] sm:$0xff]  ;;  %v1669_v62 = vld [vmem:[#allocation9 + $0x20] sm:$0xff] }
  0x59   :  { %679 = vmatpush.bf16.msrb.mxu2 %v1641_v25  ;;  %v1674_v25 = vld [vmem:[#allocation9 + $0x48] sm:$0xff] }
  0x5a   :  { %692 = vmatpush.bf16.msrb.mxu3 %v1649_v26  ;;  %v1673_v26 = vld [vmem:[#allocation9 + $0x40] sm:$0xff] }
  0x5b   :  { %770 = vmatpush.bf16.msra.mxu0 %v1664_v60  ;;  %864 = vmatpush.bf16.msra.mxu1 %v1672_v58  ;;  %v1711_v60 = vld [vmem:[%s2000_s8] ss:$0 sm:$0xff] }
  0x5f   :  { %771 = vmatpush.bf16.msra.mxu0 %v1663_v27  ;;  %865 = vmatpush.bf16.msra.mxu1 %v1671_v59 }
  0x63   :  { %772 = vmatpush.bf16.msra.mxu0 %v1662_v28  ;;  %866 = vmatpush.bf16.msra.mxu1 %v1670_v61 }
  0x67   :  { %773 = vmatpush.bf16.msra.mxu0 %v1661_v29  ;;  %867 = vmatpush.bf16.msra.mxu1 %v1669_v62 }
  0x6b   :  { %774 = vmatpush.bf16.msra.mxu0 %v1660_v30  ;;  %868 = vmatpush.bf16.msra.mxu1 %v1668_v63 }
  0x6f   :  { %775 = vmatpush.bf16.msra.mxu0 %v1659_v44  ;;  %869 = vmatpush.bf16.msra.mxu1 %v1667_v0  ;;  %v1686_v44 = vld [vmem:[#allocation9 + $0xa8] sm:$0xff] }
  0x73   :  { %776 = vmatpush.bf16.msra.mxu0 %v1658_v45  ;;  %870 = vmatpush.bf16.msra.mxu1 %v1666_v1  ;;  %v1685_v45 = vld [vmem:[#allocation9 + $0xa0] sm:$0xff] }
  0x77   :  { %777 = vmatpush.bf16.msra.mxu0 %v1657_v46  ;;  %871 = vmatpush.bf16.msra.mxu1 %v1665_v2  ;;  %v1684_v46 = vld [vmem:[#allocation9 + $0x98] sm:$0xff] }
  0xb6   :  { %v221_v34 = vpop.f32.mrf.mxu0 }
  0xb7   :  { %v222_v35 = vadd.f32 %v221_v34, %v128_v32  ;;  %v234_v36 = vpop.f32.mrf.mxu1  ;;  %v424_v32 = vperm.slane %v1301_v31, 0 }
  0xb8   :  { %v235_v37 = vadd.f32 %v234_v36, %v129_v33  ;;  %v425_v33 = vperm.slane %v1301_v31, 1 }
  0xb9   :  { %v238_v38 = vmax.f32 %v222_v35, 0.0 }
  0xba   :  { %v239_v39 = vmax.f32 %v235_v37, 0.0 }
  0xbb   :  { %v240_v40 = vpack.c.bf16 %v238_v38, %v238_v38 }
  0xbc   :  { %v241_v41 = vpack.c.bf16 %v239_v39, %v239_v39 }
  0xbd   :  { %382 = vmatmul.bf16.vlgmr.msra.gmra.mxu2 %v240_v40 }
  0xbe   :  { %395 = vmatmul.bf16.vlgmr.msra.gmra.mxu3 %v241_v41  ;;  %v223_v42 = vpop.f32.mrf.mxu0 }
  0xbf   :  { %v236_v43 = vpop.f32.mrf.mxu1 }
 0x140   :  { %v383_v12 = vpop.f32.mrf.mxu2 }
 0x141   :  { %v384_v13 = vadd.f32 %v1708_v9, %v383_v12  ;;  %v396_v14 = vpop.f32.mrf.mxu3 }
 0x143   :  { %v397_v16 = vadd.f32 %v396_v14, %v384_v13 }
 0x145   :  { %v400_v17 = vmax.f32 %v397_v16, 0.0 }
 0x147   :  { %v401_v18 = vadd.f32 %v400_v17, %v109_v15 }
 0x148   :  { %v385_v19 = vpop.f32.mrf.mxu2 }
 0x149   :  { %v402_v20 = vmax.f32 %v401_v18, 0.0  ;;  %v398_v21 = vpop.f32.mrf.mxu3  ;;  %v1680_v19 = vld [vmem:[#allocation9 + $0x78] sm:$0xff] }
 0x14a   :  { %960 = vmatpush.bf16.msra.mxu2 %v1680_v19  ;;  %v1678_v21 = vld [vmem:[#allocation9 + $0x68] sm:$0xff] }
 0x14b   :  { %v403_v22 = vpack.c.bf16 %v402_v20, %v402_v20 }
 0x14d   :  { %516 = vmatmul.bf16.vlgmr.msrb.gmra.mxu0 %v403_v22  ;;  %529 = vmatmul.bf16.vlgmr.msrb.gmra.mxu1 %v403_v22  ;;  %v1677_v22 = vld [vmem:[#allocation9 + $0x60] sm:$0xff] }
 0x1ca   :  { %v517_v34 = vpop.f32.mrf.mxu0  ;;  %v530_v35 = vpop.f32.mrf.mxu1 }
 0x1cb   :  { %v518_v36 = vadd.f32 %v517_v34, %v424_v32  ;;  %v531_v37 = vadd.f32 %v530_v35, %v425_v33 }
 0x1cd   :  { %v534_v38 = vmax.f32 %v518_v36, 0.0  ;;  %v535_v39 = vmax.f32 %v531_v37, 0.0 }
 0x1cf   :  { %v536_v40 = vpack.c.bf16 %v534_v38, %v534_v38  ;;  %v537_v41 = vpack.c.bf16 %v535_v39, %v535_v39 }
 0x1d1   :  { %680 = vmatmul.bf16.vlgmr.msrb.gmra.mxu2 %v536_v40  ;;  %693 = vmatmul.bf16.vlgmr.msrb.gmra.mxu3 %v537_v41 }
 0x1d2   :  { %v519_v42 = vpop.f32.mrf.mxu0  ;;  %v532_v43 = vpop.f32.mrf.mxu1 }
 0x1d3   :  { %v1688_v42 = vld [vmem:[#allocation9 + $0xb8] sm:$0xff]  ;;  %v1687_v43 = vld [vmem:[#allocation9 + $0xb0] sm:$0xff] }
 0x1d4   :  { %1056 = vmatpush.bf16.msra.mxu3 %v1688_v42 }
 0x1d8   :  { %1057 = vmatpush.bf16.msra.mxu3 %v1687_v43 }
 0x1dc   :  { %1058 = vmatpush.bf16.msra.mxu3 %v1686_v44 }
 0x1e0   :  { %1059 = vmatpush.bf16.msra.mxu3 %v1685_v45 }
 0x1e4   :  { %1060 = vmatpush.bf16.msra.mxu3 %v1684_v46 }
 0x254   :  { %v681_v48 = vpop.f32.mrf.mxu2  ;;  %v694_v49 = vpop.f32.mrf.mxu3 }
 0x255   :  { %v682_v50 = vadd.f32 %v1709_v47, %v681_v48  ;;  %v1683_v47 = vld [vmem:[#allocation9 + $0x90] sm:$0xff]  ;;  %v1682_v48 = vld [vmem:[#allocation9 + $0x88] sm:$0xff] }
 0x256   :  { %1061 = vmatpush.bf16.msra.mxu3 %v1683_v47 }
 0x257   :  { %v695_v51 = vadd.f32 %v694_v49, %v682_v50  ;;  %v1681_v49 = vld [vmem:[#allocation9 + $0x80] sm:$0xff]  ;;  %v1712_v50 = vld [vmem:[%s2000_s8 + $0x1] ss:$0 sm:$0xff] }
 0x259   :  { %v698_v52 = vmax.f32 %v695_v51, 0.0 }
 0x25a   :  { %1062 = vmatpush.bf16.msra.mxu3 %v1682_v48 }
 0x25b   :  { %v699_v53 = vadd.f32 %v698_v52, %v402_v20  ;;  %v1679_v20 = vld [vmem:[#allocation9 + $0x70] sm:$0xff] }
 0x25c   :  { %v683_v54 = vpop.f32.mrf.mxu2  ;;  %v696_v55 = vpop.f32.mrf.mxu3  ;;  %961 = vmatpush.bf16.msra.mxu2 %v1679_v20 }
 0x25d   :  { %v700_v56 = vmax.f32 %v699_v53, 0.0 }
 0x25e   :  { %1063 = vmatpush.bf16.msra.mxu3 %v1681_v49 }
 0x25f   :  { %v701_v57 = vpack.c.bf16 %v700_v56, %v700_v56 }
 0x260   :  { %962 = vmatpush.bf16.msra.mxu2 %v1678_v21 }
 0x261   :  { %778 = vmatmul.bf16.vlgmr.msra.gmra.mxu0 %v701_v57 }
 0x264   :  { %963 = vmatpush.bf16.msra.mxu2 %v1677_v22 }
 0x268   :  { %964 = vmatpush.bf16.msra.mxu2 %v1676_v23 }
 0x26c   :  { %965 = vmatpush.bf16.msra.mxu2 %v1675_v24 }
 0x270   :  { %966 = vmatpush.bf16.msra.mxu2 %v1674_v25 }
 0x274   :  { %967 = vmatpush.bf16.msra.mxu2 %v1673_v26 }
 0x2de   :  { %v779_v4 = vpop.f32.mrf.mxu0 }
 0x2df   :  { %v780_v5 = vadd.f32 %v1710_v3, %v779_v4  ;;  %v1696_v3 = vld [vmem:[#allocation9 + $0xf8] sm:$0xff]  ;;  %v1695_v4 = vld [vmem:[#allocation9 + $0xf0] sm:$0xff] }
 0x2e0   :  { %1152 = vmatpush.bf16.msrb.mxu0 %v1696_v3 }
 0x2e1   :  { %v783_v6 = vmin.f32 %v780_v5, 20.0  ;;  %vm793_vm0 = vcmp.gt.f32.partialorder %v780_v5, 20.0 }
 0x2e3   :  { %v784_v7 = vmul.f32 1.442695, %v783_v6  ;;  %v1693_v6 = vld [vmem:[#allocation9 + $0xe0] sm:$0xff] }
 0x2e4   :  { %1153 = vmatpush.bf16.msrb.mxu0 %v1695_v4 }
 0x2e5   :  { %1715 = vpow2.f32 %v784_v7  ;;  %v1692_v7 = vld [vmem:[#allocation9 + $0xd8] sm:$0xff] }
 0x2e6   :  { %v781_v8 = vpop.f32.mrf.mxu0 }
 0x2e7   :  { %v1691_v8 = vld [vmem:[#allocation9 + $0xd0] sm:$0xff] }
 0x2eb   :  { %v1716_v9 = vpop.eup %1715 }
 0x2ec   :  { %v786_v10 = vmul.f32 %v1716_v9, %v1716_v9  ;;  %v787_v11 = vmul.f32 2.0, %v1716_v9  ;;  %v1690_v9 = vld [vmem:[#allocation9 + $0xc8] sm:$0xff] }
 0x2ee   :  { %v788_v12 = vadd.f32 %v787_v11, %v786_v10  ;;  %v1689_v10 = vld [vmem:[#allocation9 + $0xc0] sm:$0xff]  ;;  %v1713_v11 = vld [vmem:[%s2000_s8 + $0x2] ss:$0 sm:$0xff] }
 0x2f0   :  { %v790_v13 = vadd.f32 2.0, %v788_v12  ;;  %v789_v14 = vmul.f32 %v788_v12, %v780_v5 }
 0x2f2   :  { %1717 = vrcp.f32 %v790_v13 }
 0x2f8   :  { %v1718_v15 = vpop.eup %1717 }
 0x2f9   :  { %v792_v16 = vmul.f32 %v1718_v15, %v789_v14 }
 0x2fb   :  { %v794_v17 = vsel %vm793_vm0, %v780_v5, %v792_v16  ;;  %v1694_v5 = vld [vmem:[#allocation9 + $0xe8] sm:$0xff] }
 0x2fc   :  { %v795_v18 = vpack.c.bf16 %v794_v17, %v794_v17  ;;  %1154 = vmatpush.bf16.msrb.mxu0 %v1694_v5 }
 0x2fe   :  { %872 = vmatmul.bf16.vlgmr.msra.gmra.mxu1 %v795_v18 }
 0x300   :  { %1155 = vmatpush.bf16.msrb.mxu0 %v1693_v6 }
 0x304   :  { %1156 = vmatpush.bf16.msrb.mxu0 %v1692_v7 }
 0x308   :  { %1157 = vmatpush.bf16.msrb.mxu0 %v1691_v8 }
 0x30c   :  { %1158 = vmatpush.bf16.msrb.mxu0 %v1690_v9 }
 0x310   :  { %1159 = vmatpush.bf16.msrb.mxu0 %v1689_v10 }
 0x37b   :  { %v873_v27 = vpop.f32.mrf.mxu1 }
 0x37c   :  { %v874_v28 = vadd.f32 %v1711_v60, %v873_v27  ;;  %v1714_v60 = vld [vmem:[%s2000_s8 + $0x3] ss:$0 sm:$0xff] }
 0x37e   :  { %v877_v29 = vmin.f32 %v874_v28, 20.0  ;;  %vm887_vm1 = vcmp.gt.f32.partialorder %v874_v28, 20.0 }
 0x380   :  { %v878_v30 = vmul.f32 1.442695, %v877_v29 }
 0x382   :  { %1719 = vpow2.f32 %v878_v30 }
 0x383   :  { %v875_v31 = vpop.f32.mrf.mxu1 }
 0x388   :  { %v1720_v32 = vpop.eup %1719 }
 0x389   :  { %v880_v33 = vmul.f32 %v1720_v32, %v1720_v32  ;;  %v881_v34 = vmul.f32 2.0, %v1720_v32 }
 0x38b   :  { %v882_v35 = vadd.f32 %v881_v34, %v880_v33 }
 0x38d   :  { %v884_v36 = vadd.f32 2.0, %v882_v35  ;;  %v883_v37 = vmul.f32 %v882_v35, %v874_v28 }
 0x38f   :  { %1721 = vrcp.f32 %v884_v36 }
 0x395   :  { %v1722_v38 = vpop.eup %1721 }
 0x396   :  { %v886_v39 = vmul.f32 %v1722_v38, %v883_v37 }
 0x398   :  { %v888_v40 = vsel %vm887_vm1, %v874_v28, %v886_v39 }
 0x399   :  { %v889_v41 = vpack.c.bf16 %v888_v40, %v888_v40 }
 0x39b   :  { %968 = vmatmul.bf16.vlgmr.msra.gmra.mxu2 %v889_v41 }
 0x41e   :  { %v969_v51 = vpop.f32.mrf.mxu2 }
 0x41f   :  { %v970_v52 = vadd.f32 %v1712_v50, %v969_v51 }
 0x421   :  { %v973_v53 = vmin.f32 %v970_v52, 20.0  ;;  %vm983_vm2 = vcmp.gt.f32.partialorder %v970_v52, 20.0 }
 0x423   :  { %v974_v54 = vmul.f32 1.442695, %v973_v53 }
 0x425   :  { %1723 = vpow2.f32 %v974_v54 }
 0x426   :  { %v971_v55 = vpop.f32.mrf.mxu2 }
 0x42b   :  { %v1724_v56 = vpop.eup %1723 }
 0x42c   :  { %v976_v57 = vmul.f32 %v1724_v56, %v1724_v56  ;;  %v977_v58 = vmul.f32 2.0, %v1724_v56 }
 0x42e   :  { %v978_v59 = vadd.f32 %v977_v58, %v976_v57 }
 0x430   :  { %v980_v61 = vadd.f32 2.0, %v978_v59  ;;  %v979_v62 = vmul.f32 %v978_v59, %v970_v52 }
 0x432   :  { %1725 = vrcp.f32 %v980_v61 }
 0x438   :  { %v1726_v63 = vpop.eup %1725 }
 0x439   :  { %v982_v0 = vmul.f32 %v1726_v63, %v979_v62 }
 0x43b   :  { %v984_v1 = vsel %vm983_vm2, %v970_v52, %v982_v0 }
 0x43c   :  { %v985_v2 = vpack.c.bf16 %v984_v1, %v984_v1 }
 0x43e   :  { %1064 = vmatmul.bf16.vlgmr.msra.gmra.mxu3 %v985_v2 }
 0x4c1   :  { %v1065_v12 = vpop.f32.mrf.mxu3 }
 0x4c2   :  { %v1066_v13 = vadd.f32 %v1713_v11, %v1065_v12 }
 0x4c4   :  { %v1069_v14 = vmin.f32 %v1066_v13, 20.0  ;;  %vm1079_vm3 = vcmp.gt.f32.partialorder %v1066_v13, 20.0 }
 0x4c6   :  { %v1070_v15 = vmul.f32 1.442695, %v1069_v14 }
 0x4c8   :  { %1727 = vpow2.f32 %v1070_v15 }
 0x4c9   :  { %v1067_v16 = vpop.f32.mrf.mxu3 }
 0x4ce   :  { %v1728_v17 = vpop.eup %1727 }
 0x4cf   :  { %v1072_v18 = vmul.f32 %v1728_v17, %v1728_v17  ;;  %v1073_v19 = vmul.f32 2.0, %v1728_v17 }
 0x4d1   :  { %v1074_v20 = vadd.f32 %v1073_v19, %v1072_v18 }
 0x4d3   :  { %v1076_v21 = vadd.f32 2.0, %v1074_v20  ;;  %v1075_v22 = vmul.f32 %v1074_v20, %v1066_v13 }
 0x4d5   :  { %1729 = vrcp.f32 %v1076_v21 }
 0x4db   :  { %v1730_v23 = vpop.eup %1729 }
 0x4dc   :  { %v1078_v24 = vmul.f32 %v1730_v23, %v1075_v22 }
 0x4de   :  { %v1080_v25 = vsel %vm1079_vm3, %v1066_v13, %v1078_v24 }
 0x4df   :  { %v1081_v26 = vpack.c.bf16 %v1080_v25, %v1080_v25 }
 0x4e1   :  { %1160 = vmatmul.bf16.vlgmr.msrb.gmra.mxu0 %v1081_v26 }
 0x55e   :  { %v1161_v27 = vpop.f32.mrf.mxu0 }
 0x55f   :  { %v1162_v28 = vadd.f32 %v1714_v60, %v1161_v27 }
 0x561   :  { %1165 = vst [vmem:[%s2001_s9] sm:$0xff] %v1162_v28 }
 0x566   :  { %v1163_v29 = vpop.f32.mrf.mxu0 }
 0x567   :  { %1170 = vsyncpa [#allocation3], 1 }
 0x568   :  { %1171 = vsyncpa [#allocation5], 1 }
 0x569   :  { %1172 = vsyncpa [#allocation8], 1 }

</bundles_post_ra>
